<compile_context>
chip_gen: v7x
topology: tpu7x:2x2x1
jax: 0.10.0
libtpu: 0.0.40
codegen_flags: <defaults>
</compile_context>

<pallas_src>
import functools

import numpy as np

import jax
import jax.numpy as jnp
from jax import lax
from jax.experimental import pallas as pl
from jax.experimental.pallas import tpu as pltpu


def _round_up(x, m):
    return (x + m - 1) // m * m


def _flash_kernel(qi_tab, ki_tab, last_tab, q_ref, kv_ref, o_ref,
                  m_scr, l_scr, acc_scr, qs_scr, row_scr, *,
                  scale, causal, seqlen_q, seqlen_k, block_q, block_k,
                  n_kv_blocks, g, k_padded):
    # q_ref: (1, g, block_q, D); kv_ref: (1, 2, 1, block_k, D)
    i = pl.program_id(2)
    qi = qi_tab[i]          # query-tile index of this step
    ki = ki_tab[i]          # kv-tile index of this step
    is_last = last_tab[i] == 1
    mq = g * block_q        # folded M (all query heads of one KV group)

    @pl.when(ki == 0)
    def _init():
        m_scr[...] = jnp.full((mq, 1), -jnp.inf, jnp.float32)
        l_scr[...] = jnp.zeros((mq, 1), jnp.float32)
        acc_scr[...] = jnp.zeros(acc_scr.shape, jnp.float32)
        # Hoist q*scale out of the KV loop (once per q tile, not per KV step)
        # and fold the g query heads into one (g*block_q, D) LHS via cheap
        # static slice copies (no in-kernel reshape needed).
        for j in range(g):
            qs_scr[pl.ds(j * block_q, block_q), :] = q_ref[0, j] * scale
            row_scr[pl.ds(j * block_q, block_q), :] = lax.broadcasted_iota(
                jnp.int32, (block_q, 1), 0)

    def _tile(apply_causal_mask, apply_pad_mask):
        q = qs_scr[...]                      # (mq, D), already scaled
        k = kv_ref[0, 0, 0]                  # (block_k, D)
        v = kv_ref[0, 1, 0]                  # (block_k, D)

        # scores (mq, block_k): contract last dims directly, no .T copy.
        s = lax.dot_general(q, k, (((1,), (1,)), ((), ())),
                            preferred_element_type=jnp.float32)

        if apply_causal_mask or apply_pad_mask:
            cols = ki * block_k + lax.broadcasted_iota(
                jnp.int32, (mq, block_k), 1)
            if apply_causal_mask:
                rows = qi * block_q + row_scr[...]        # (mq, 1) broadcast
                # Same finite fill value as the torch reference.
                s = jnp.where(cols > rows + (seqlen_k - seqlen_q), -10000.0, s)
            if apply_pad_mask:
                # Keys beyond the true seqlen_k are wrapper padding: kill hard.
                s = jnp.where(cols >= seqlen_k, -1e30, s)

        m_prev = m_scr[...]
        m_new = jnp.maximum(m_prev, jnp.max(s, axis=-1, keepdims=True))
        alpha = jnp.exp(m_prev - m_new)
        p = jnp.exp(s - m_new)
        l_scr[...] = alpha * l_scr[...] + jnp.sum(p, axis=-1, keepdims=True)
        acc_scr[...] = alpha * acc_scr[...] + jnp.dot(
            p.astype(v.dtype), v, preferred_element_type=jnp.float32)
        m_scr[...] = m_new

    if causal:
        shift = seqlen_k - seqlen_q
        first_row = qi * block_q + shift
        last_row = first_row + (block_q - 1)
        first_col = ki * block_k
        last_col = first_col + (block_k - 1)

        # Fully visible KV tile: no mask work at all.
        @pl.when(last_col <= first_row)
        def _full():
            _tile(False, False)

        # Diagonal (partially masked) tile: iota mask only here.  Padded key
        # columns can only live in a diagonal tile, so the pad mask is only
        # paid here, never on full tiles.
        @pl.when(jnp.logical_and(first_col <= last_row, last_col > first_row))
        def _diag():
            _tile(True, k_padded)
        # Fully masked tiles never appear in the (triangular) step table.
    else:
        if k_padded:
            # Pay the pad mask only on the last KV tile.
            @pl.when(ki == n_kv_blocks - 1)
            def _last_tile():
                _tile(False, True)

            @pl.when(ki != n_kv_blocks - 1)
            def _inner_tile():
                _tile(False, False)
        else:
            _tile(False, False)

    @pl.when(is_last)
    def _finalize():
        l = l_scr[...]
        # TODO(synk): causal query rows with no visible key (Sq > Sk shifts)
        # emit zeros; the torch reference yields a uniform softmax over the
        # -10000-masked scores there.
        inv = 1.0 / jnp.where(l == 0.0, 1.0, l)   # exact; once per q tile
        out = (acc_scr[...] * inv).astype(o_ref.dtype)
        for j in range(g):
            o_ref[0, j] = out[j * block_q:(j + 1) * block_q, :]


def cross_attention(q, kv, *, causal=False, softmax_scale=None,
                    block_q=512, block_k=512):
    """q: (B, Sq, H, D); kv: (B, Sk, 2, Hkv, D). Returns (B, Sq, H, D)."""
    B, Sq, H, D = q.shape
    Bk, Sk, two, Hkv, Dk = kv.shape
    assert Bk == B and two == 2 and Dk == D and H % Hkv == 0
    g = H // Hkv

    scale = float(softmax_scale) if softmax_scale is not None else float(D) ** -0.5

    itemsize = jnp.dtype(q.dtype).itemsize
    # Sublane multiple per dtype: 8 for 32-bit, 16 for bf16, 32 for 8-bit.
    sub = max(8, 32 // itemsize)

    # Cap the folded M (= g*block_q) so the f32 score tile stays modest.
    max_bq = max(sub, (2048 // g) // sub * sub)
    block_q = min(block_q, max_bq)

    sq_ceil = _round_up(Sq, sub)
    sk_ceil = _round_up(Sk, sub)
    block_q = _round_up(min(block_q, sq_ceil), sub)
    block_k = _round_up(min(block_k, sk_ceil), sub)
    sq_pad = _round_up(Sq, block_q)
    sk_pad = _round_up(Sk, block_k)
    n_q, n_k = sq_pad // block_q, sk_pad // block_k
    k_padded = sk_pad != Sk

    # TODO(synk): the relayout + pad below are separate HBM passes outside the
    # kernel; emit the upstream projections directly in (B, H, Sq, D) /
    # (B, 2, Hkv, Sk, D) (or rely on XLA fusing these into the producers).
    q_t = jnp.transpose(q, (0, 2, 1, 3))          # (B, H, Sq, D)
    kv_t = jnp.transpose(kv, (0, 2, 3, 1, 4))     # (B, 2, Hkv, Sk, D)
    if sq_pad != Sq:
        q_t = jnp.pad(q_t, ((0, 0), (0, 0), (0, sq_pad - Sq), (0, 0)))
    if k_padded:
        kv_t = jnp.pad(kv_t, ((0, 0), (0, 0), (0, 0), (0, sk_pad - Sk), (0, 0)))

    # Flattened (qi, ki) step tables (scalar-prefetched to SMEM):
    # rectangular for full attention, triangular for causal so fully-masked
    # KV tiles never cost a pipeline step.
    shift = Sk - Sq
    qi_list, ki_list, last_list = [], [], []
    for qi in range(n_q):
        if causal:
            last_row = qi * block_q + block_q - 1 + shift
            kmax = min(max(last_row // block_k, 0), n_k - 1)
        else:
            kmax = n_k - 1
        for ki in range(kmax + 1):
            qi_list.append(qi)
            ki_list.append(ki)
            last_list.append(1 if ki == kmax else 0)
    qi_tab = jnp.asarray(np.array(qi_list, dtype=np.int32))
    ki_tab = jnp.asarray(np.array(ki_list, dtype=np.int32))
    last_tab = jnp.asarray(np.array(last_list, dtype=np.int32))
    n_steps = len(qi_list)

    mq = g * block_q
    kv_itemsize = jnp.dtype(kv.dtype).itemsize

    # Explicit VMEM budget (double-buffered blocks + scratch + f32 s/p temps),
    # clamped to stay inside v7x's 64 MiB while giving headroom on v5e/v6e.
    est = (2 * mq * D * itemsize                 # q blocks
           + 2 * 2 * block_k * D * kv_itemsize   # fused K/V blocks
           + 2 * mq * D * itemsize               # out blocks
           + mq * D * 4 + 2 * mq * 4             # acc, m, l
           + mq * D * itemsize + mq * 4          # scaled-q + row-pos scratch
           + 2 * mq * block_k * 4)               # f32 s / p temporaries
    vmem_limit = int(min(64 * 1024 * 1024, max(32 * 1024 * 1024, 2 * est)))

    kernel = functools.partial(
        _flash_kernel,
        scale=scale, causal=bool(causal), seqlen_q=Sq, seqlen_k=Sk,
        block_q=block_q, block_k=block_k, n_kv_blocks=n_k, g=g,
        k_padded=k_padded)

    grid_spec = pltpu.PrefetchScalarGridSpec(
        num_scalar_prefetch=3,
        grid=(B, Hkv, n_steps),
        in_specs=[
            # q: one block carries all g heads of the KV group.
            pl.BlockSpec((1, g, block_q, D),
                         lambda b, h, i, qt, kt, lt: (b, h, qt[i], 0)),
            # fused K+V block: one DMA per step for both.
            pl.BlockSpec((1, 2, 1, block_k, D),
                         lambda b, h, i, qt, kt, lt: (b, 0, h, kt[i], 0)),
        ],
        out_specs=pl.BlockSpec((1, g, block_q, D),
                               lambda b, h, i, qt, kt, lt: (b, h, qt[i], 0)),
        scratch_shapes=[
            pltpu.VMEM((mq, 1), jnp.float32),   # m (running max)
            pltpu.VMEM((mq, 1), jnp.float32),   # l (running sum)
            pltpu.VMEM((mq, D), jnp.float32),   # acc
            pltpu.VMEM((mq, D), q.dtype),       # pre-scaled q (per q tile)
            pltpu.VMEM((mq, 1), jnp.int32),     # row-in-block positions
        ],
    )

    out_t = pl.pallas_call(
        kernel,
        out_shape=jax.ShapeDtypeStruct((B, H, sq_pad, D), q.dtype),
        grid_spec=grid_spec,
        compiler_params=pltpu.CompilerParams(
            dimension_semantics=("parallel", "parallel", "arbitrary"),
            vmem_limit_bytes=vmem_limit),
    )(qi_tab, ki_tab, last_tab, q_t, kv_t)

    # TODO(synk): attention_dropout > 0.0 not implemented (module default is
    # 0.0 / eval mode).
    out = out_t[:, :, :Sq, :] if sq_pad != Sq else out_t
    return jnp.transpose(out, (0, 2, 1, 3))


def _reference(q, kv, *, causal=False, softmax_scale=None):
    """Pure-JAX reference mirroring the PyTorch module."""
    B, Sq, H, D = q.shape
    Sk = kv.shape[1]
    if kv.shape[3] != H:
        kv = jnp.repeat(kv, H // kv.shape[3], axis=3)
    k, v = kv[:, :, 0], kv[:, :, 1]
    scale = softmax_scale if softmax_scale is not None else D ** (-0.5)
    scores = jnp.einsum('bthd,bshd->bhts', q, k * scale)
    if causal:
        row = jnp.arange(Sq)[:, None]
        col = jnp.arange(Sk)[None, :]
        mask = col > row + Sk - Sq
        scores = jnp.where(mask, -10000.0, scores)
    attn = jax.nn.softmax(scores, axis=-1).astype(v.dtype)
    return jnp.einsum('bhts,bshd->bthd', attn, v)


def _check(q, kv, causal, **kw):
    out = jax.block_until_ready(cross_attention(q, kv, causal=causal, **kw))
    ref = _reference(q, kv, causal=causal)
    assert out.shape == ref.shape
    err = float(jnp.max(jnp.abs(out - ref)))
    assert jnp.allclose(out, ref, atol=2e-2, rtol=2e-2), f"max abs err {err}"


if __name__ == "__main__":
    key = jax.random.PRNGKey(0)
    k1, k2, k3, k4 = jax.random.split(key, 4)

    # 1) Small GQA-style shapes, single tile, causal + non-causal.
    B, Sq, Sk, H, Hkv, D = 2, 8, 8, 4, 2, 32
    q = jax.random.normal(k1, (B, Sq, H, D), dtype=jnp.float32)
    kv = jax.random.normal(k2, (B, Sk, 2, Hkv, D), dtype=jnp.float32)
    _check(q, kv, causal=True)
    _check(q, kv, causal=False)

    # 2) Multi-tile flash path (several KV tiles + triangular causal grid).
    q2 = jax.random.normal(k3, (2, 16, 4, 32), dtype=jnp.float32)
    kv2 = jax.random.normal(k4, (2, 16, 2, 2, 32), dtype=jnp.float32)
    _check(q2, kv2, causal=True, block_q=8, block_k=8)

    # 3) Ragged lengths (query + key padding paths), Sq < Sk causal shift.
    q3 = q2[:, :12]
    kv3 = jnp.concatenate([kv2, kv2[:, :4]], axis=1)   # Sk = 20
    _check(q3, kv3, causal=True, block_q=8, block_k=8)
    _check(q3, kv3, causal=False, block_q=8, block_k=8)

    print("KERNEL_OK")
</pallas_src>

<mosaic_0001>
module attributes {stable_mosaic.version = 11 : i64} {
  func.func @_flash_kernel(%arg0: i32, %arg1: i32, %arg2: i32, %arg3: memref<1xi32, #tpu.memory_space<smem>>, %arg4: memref<1xi32, #tpu.memory_space<smem>>, %arg5: memref<1xi32, #tpu.memory_space<smem>>, %arg6: memref<1x2x8x32xf32, #tpu.memory_space<vmem>>, %arg7: memref<1x2x1x8x32xf32, #tpu.memory_space<vmem>>, %arg8: memref<1x2x8x32xf32, #tpu.memory_space<vmem>>, %arg9: memref<16x1xf32, #tpu.memory_space<vmem>>, %arg10: memref<16x1xf32, #tpu.memory_space<vmem>>, %arg11: memref<16x32xf32, #tpu.memory_space<vmem>>, %arg12: memref<16x32xf32, #tpu.memory_space<vmem>>, %arg13: memref<16x1xi32, #tpu.memory_space<vmem>>) attributes {dimension_semantics = [#tpu.dimension_semantics<parallel>, #tpu.dimension_semantics<parallel>, #tpu.dimension_semantics<arbitrary>], iteration_bounds = array<i64: 2, 2, 1>, scalar_prefetch = 3 : i64, scratch_operands = 5 : i64, tpu.core_type = #tpu.core_type<tc>, window_params = [{transform_indices = @transform_0, window_bounds = array<i64: 1, 2, 8, 32>}, {transform_indices = @transform_1, window_bounds = array<i64: 1, 2, 1, 8, 32>}, {transform_indices = @transform_2, window_bounds = array<i64: 1, 2, 8, 32>}]} {
    %0 = arith.index_cast %arg2 : i32 to index
    %1 = memref.load %arg3[%0] : memref<1xi32, #tpu.memory_space<smem>>
    %2 = arith.index_cast %arg2 : i32 to index
    %3 = memref.load %arg4[%2] : memref<1xi32, #tpu.memory_space<smem>>
    %4 = arith.index_cast %arg2 : i32 to index
    %5 = memref.load %arg5[%4] : memref<1xi32, #tpu.memory_space<smem>>
    %c1_i32 = arith.constant 1 : i32
    %6 = arith.cmpi eq, %5, %c1_i32 : i32
    %c0_i32 = arith.constant 0 : i32
    %7 = arith.cmpi eq, %3, %c0_i32 : i32
    %8 = arith.extui %7 : i1 to i32
    %c0_i32_0 = arith.constant 0 : i32
    %9 = arith.cmpi ne, %8, %c0_i32_0 : i32
    scf.if %9 {
      %cst = arith.constant 0xFF800000 : f32
      %25 = vector.broadcast %cst : f32 to vector<16x1xf32>
      %c0 = arith.constant 0 : index
      %c0_7 = arith.constant 0 : index
      %26 = vector.load %arg9[%c0, %c0_7] : memref<16x1xf32, #tpu.memory_space<vmem>>, vector<16x1xf32>
      tpu.vector_store %arg9[%c0, %c0_7], %25 {strides = array<i32>} : memref<16x1xf32, #tpu.memory_space<vmem>>, vector<16x1xf32>,
      %cst_8 = arith.constant 0.000000e+00 : f32
      %27 = vector.broadcast %cst_8 : f32 to vector<16x1xf32>
      %c0_9 = arith.constant 0 : index
      %c0_10 = arith.constant 0 : index
      %28 = vector.load %arg10[%c0_9, %c0_10] : memref<16x1xf32, #tpu.memory_space<vmem>>, vector<16x1xf32>
      tpu.vector_store %arg10[%c0_9, %c0_10], %27 {strides = array<i32>} : memref<16x1xf32, #tpu.memory_space<vmem>>, vector<16x1xf32>,
      %cst_11 = arith.constant 0.000000e+00 : f32
      %29 = vector.broadcast %cst_11 : f32 to vector<16x32xf32>
      %c0_12 = arith.constant 0 : index
      %c0_13 = arith.constant 0 : index
      %30 = vector.load %arg11[%c0_12, %c0_13] : memref<16x32xf32, #tpu.memory_space<vmem>>, vector<16x32xf32>
      tpu.vector_store %arg11[%c0_12, %c0_13], %29 {strides = array<i32>} : memref<16x32xf32, #tpu.memory_space<vmem>>, vector<16x32xf32>,
      %c0_14 = arith.constant 0 : index
      %c0_15 = arith.constant 0 : index
      %c0_16 = arith.constant 0 : index
      %c0_17 = arith.constant 0 : index
      %31 = vector.load %arg6[%c0_14, %c0_15, %c0_16, %c0_17] : memref<1x2x8x32xf32, #tpu.memory_space<vmem>>, vector<1x1x8x32xf32>
      %32 = vector.shape_cast %31 : vector<1x1x8x32xf32> to vector<8x32xf32>
      %cst_18 = arith.constant 0.176776692 : f32
      %33 = vector.broadcast %cst_18 : f32 to vector<8x32xf32>
      %34 = arith.mulf %32, %33 : vector<8x32xf32>
      %c0_19 = arith.constant 0 : index
      %c0_20 = arith.constant 0 : index
      %35 = vector.load %arg12[%c0_19, %c0_20] : memref<16x32xf32, #tpu.memory_space<vmem>>, vector<8x32xf32>
      tpu.vector_store %arg12[%c0_19, %c0_20], %34 {strides = array<i32>} : memref<16x32xf32, #tpu.memory_space<vmem>>, vector<8x32xf32>,
      %36 = tpu.iota {dimensions = array<i32: 0>} : vector<8x1xi32>
      %c0_21 = arith.constant 0 : index
      %c0_22 = arith.constant 0 : index
      %37 = vector.load %arg13[%c0_21, %c0_22] : memref<16x1xi32, #tpu.memory_space<vmem>>, vector<8x1xi32>
      tpu.vector_store %arg13[%c0_21, %c0_22], %36 {strides = array<i32>} : memref<16x1xi32, #tpu.memory_space<vmem>>, vector<8x1xi32>,
      %c0_23 = arith.constant 0 : index
      %c1 = arith.constant 1 : index
      %c0_24 = arith.constant 0 : index
      %c0_25 = arith.constant 0 : index
      %38 = vector.load %arg6[%c0_23, %c1, %c0_24, %c0_25] : memref<1x2x8x32xf32, #tpu.memory_space<vmem>>, vector<1x1x8x32xf32>
      %39 = vector.shape_cast %38 : vector<1x1x8x32xf32> to vector<8x32xf32>
      %cst_26 = arith.constant 0.176776692 : f32
      %40 = vector.broadcast %cst_26 : f32 to vector<8x32xf32>
      %41 = arith.mulf %39, %40 : vector<8x32xf32>
      %c8 = arith.constant 8 : index
      %c0_27 = arith.constant 0 : index
      %42 = vector.load %arg12[%c8, %c0_27] : memref<16x32xf32, #tpu.memory_space<vmem>>, vector<8x32xf32>
      tpu.vector_store %arg12[%c8, %c0_27], %41 {strides = array<i32>} : memref<16x32xf32, #tpu.memory_space<vmem>>, vector<8x32xf32>,
      %43 = tpu.iota {dimensions = array<i32: 0>} : vector<8x1xi32>
      %c8_28 = arith.constant 8 : index
      %c0_29 = arith.constant 0 : index
      %44 = vector.load %arg13[%c8_28, %c0_29] : memref<16x1xi32, #tpu.memory_space<vmem>>, vector<8x1xi32>
      tpu.vector_store %arg13[%c8_28, %c0_29], %43 {strides = array<i32>} : memref<16x1xi32, #tpu.memory_space<vmem>>, vector<8x1xi32>,
    } else {
    }
    %c8_i32 = arith.constant 8 : i32
    %10 = arith.muli %1, %c8_i32 : i32
    %c0_i32_1 = arith.constant 0 : i32
    %11 = arith.addi %10, %c0_i32_1 : i32
    %c7_i32 = arith.constant 7 : i32
    %12 = arith.addi %11, %c7_i32 : i32
    %c8_i32_2 = arith.constant 8 : i32
    %13 = arith.muli %3, %c8_i32_2 : i32
    %c7_i32_3 = arith.constant 7 : i32
    %14 = arith.addi %13, %c7_i32_3 : i32
    %15 = arith.cmpi sle, %14, %11 : i32
    %16 = arith.extui %15 : i1 to i32
    %c0_i32_4 = arith.constant 0 : i32
    %17 = arith.cmpi ne, %16, %c0_i32_4 : i32
    scf.if %17 {
      %c0 = arith.constant 0 : index
      %c0_7 = arith.constant 0 : index
      %25 = vector.load %arg12[%c0, %c0_7] : memref<16x32xf32, #tpu.memory_space<vmem>>, vector<16x32xf32>
      %c0_8 = arith.constant 0 : index
      %c0_9 = arith.constant 0 : index
      %c0_10 = arith.constant 0 : index
      %c0_11 = arith.constant 0 : index
      %c0_12 = arith.constant 0 : index
      %26 = vector.load %arg7[%c0_8, %c0_9, %c0_10, %c0_11, %c0_12] : memref<1x2x1x8x32xf32, #tpu.memory_space<vmem>>, vector<1x1x1x8x32xf32>
      %27 = vector.shape_cast %26 : vector<1x1x1x8x32xf32> to vector<8x32xf32>
      %c0_13 = arith.constant 0 : index
      %c1 = arith.constant 1 : index
      %c0_14 = arith.constant 0 : index
      %c0_15 = arith.constant 0 : index
      %c0_16 = arith.constant 0 : index
      %28 = vector.load %arg7[%c0_13, %c1, %c0_14, %c0_15, %c0_16] : memref<1x2x1x8x32xf32, #tpu.memory_space<vmem>>, vector<1x1x1x8x32xf32>
      %29 = vector.shape_cast %28 : vector<1x1x1x8x32xf32> to vector<8x32xf32>
      %cst = arith.constant dense<0.000000e+00> : vector<16x8xf32>
      %30 = tpu.matmul %25, %27, %cst {dimension_numbers = #tpu.dot_dimension_numbers<[1], [1], [0], [0], [0, 0, 1, 0], [], []>} : vector<16x32xf32>, vector<8x32xf32>, vector<16x8xf32> -> vector<16x8xf32>
      %c0_17 = arith.constant 0 : index
      %c0_18 = arith.constant 0 : index
      %31 = vector.load %arg9[%c0_17, %c0_18] : memref<16x1xf32, #tpu.memory_space<vmem>>, vector<16x1xf32>
      %cst_19 = arith.constant dense<0xFF800000> : vector<16xf32>
      %32 = vector.multi_reduction <maximumf>, %30, %cst_19 [1] : vector<16x8xf32> to vector<16xf32>
      %33 = vector.shape_cast %32 : vector<16xf32> to vector<16x1xf32>
      %34 = arith.maximumf %31, %33 : vector<16x1xf32>
      %35 = arith.subf %31, %34 : vector<16x1xf32>
      %36 = math.exp %35 : vector<16x1xf32>
      %37 = vector.broadcast %34 : vector<16x1xf32> to vector<16x8xf32>
      %38 = arith.subf %30, %37 : vector<16x8xf32>
      %39 = math.exp %38 : vector<16x8xf32>
      %c0_20 = arith.constant 0 : index
      %c0_21 = arith.constant 0 : index
      %40 = vector.load %arg10[%c0_20, %c0_21] : memref<16x1xf32, #tpu.memory_space<vmem>>, vector<16x1xf32>
      %41 = arith.mulf %36, %40 : vector<16x1xf32>
      %cst_22 = arith.constant dense<0.000000e+00> : vector<16xf32>
      %42 = vector.multi_reduction <add>, %39, %cst_22 [1] : vector<16x8xf32> to vector<16xf32>
      %43 = vector.shape_cast %42 : vector<16xf32> to vector<16x1xf32>
      %44 = arith.addf %41, %43 : vector<16x1xf32>
      %c0_23 = arith.constant 0 : index
      %c0_24 = arith.constant 0 : index
      %45 = vector.load %arg10[%c0_23, %c0_24] : memref<16x1xf32, #tpu.memory_space<vmem>>, vector<16x1xf32>
      tpu.vector_store %arg10[%c0_23, %c0_24], %44 {strides = array<i32>} : memref<16x1xf32, #tpu.memory_space<vmem>>, vector<16x1xf32>,
      %c0_25 = arith.constant 0 : index
      %c0_26 = arith.constant 0 : index
      %46 = vector.load %arg11[%c0_25, %c0_26] : memref<16x32xf32, #tpu.memory_space<vmem>>, vector<16x32xf32>
      %47 = vector.broadcast %36 : vector<16x1xf32> to vector<16x32xf32>
      %48 = arith.mulf %47, %46 : vector<16x32xf32>
      %cst_27 = arith.constant dense<0.000000e+00> : vector<16x32xf32>
      %49 = tpu.matmul %39, %29, %cst_27 {dimension_numbers = #tpu.dot_dimension_numbers<[1], [0], [0], [1], [0, 0, 1, 1], [], []>} : vector<16x8xf32>, vector<8x32xf32>, vector<16x32xf32> -> vector<16x32xf32>
      %50 = arith.addf %48, %49 : vector<16x32xf32>
      %c0_28 = arith.constant 0 : index
      %c0_29 = arith.constant 0 : index
      %51 = vector.load %arg11[%c0_28, %c0_29] : memref<16x32xf32, #tpu.memory_space<vmem>>, vector<16x32xf32>
      tpu.vector_store %arg11[%c0_28, %c0_29], %50 {strides = array<i32>} : memref<16x32xf32, #tpu.memory_space<vmem>>, vector<16x32xf32>,
      %c0_30 = arith.constant 0 : index
      %c0_31 = arith.constant 0 : index
      %52 = vector.load %arg9[%c0_30, %c0_31] : memref<16x1xf32, #tpu.memory_space<vmem>>, vector<16x1xf32>
      tpu.vector_store %arg9[%c0_30, %c0_31], %34 {strides = array<i32>} : memref<16x1xf32, #tpu.memory_space<vmem>>, vector<16x1xf32>,
    } else {
    }
    %18 = arith.cmpi sle, %13, %12 : i32
    %19 = arith.cmpi sgt, %14, %11 : i32
    %20 = arith.andi %18, %19 : i1
    %21 = arith.extui %20 : i1 to i32
    %c0_i32_5 = arith.constant 0 : i32
    %22 = arith.cmpi ne, %21, %c0_i32_5 : i32
    scf.if %22 {
      %c0 = arith.constant 0 : index
      %c0_7 = arith.constant 0 : index
      %25 = vector.load %arg12[%c0, %c0_7] : memref<16x32xf32, #tpu.memory_space<vmem>>, vector<16x32xf32>
      %c0_8 = arith.constant 0 : index
      %c0_9 = arith.constant 0 : index
      %c0_10 = arith.constant 0 : index
      %c0_11 = arith.constant 0 : index
      %c0_12 = arith.constant 0 : index
      %26 = vector.load %arg7[%c0_8, %c0_9, %c0_10, %c0_11, %c0_12] : memref<1x2x1x8x32xf32, #tpu.memory_space<vmem>>, vector<1x1x1x8x32xf32>
      %27 = vector.shape_cast %26 : vector<1x1x1x8x32xf32> to vector<8x32xf32>
      %c0_13 = arith.constant 0 : index
      %c1 = arith.constant 1 : index
      %c0_14 = arith.constant 0 : index
      %c0_15 = arith.constant 0 : index
      %c0_16 = arith.constant 0 : index
      %28 = vector.load %arg7[%c0_13, %c1, %c0_14, %c0_15, %c0_16] : memref<1x2x1x8x32xf32, #tpu.memory_space<vmem>>, vector<1x1x1x8x32xf32>
      %29 = vector.shape_cast %28 : vector<1x1x1x8x32xf32> to vector<8x32xf32>
      %cst = arith.constant dense<0.000000e+00> : vector<16x8xf32>
      %30 = tpu.matmul %25, %27, %cst {dimension_numbers = #tpu.dot_dimension_numbers<[1], [1], [0], [0], [0, 0, 1, 0], [], []>} : vector<16x32xf32>, vector<8x32xf32>, vector<16x8xf32> -> vector<16x8xf32>
      %c8_i32_17 = arith.constant 8 : i32
      %31 = arith.muli %3, %c8_i32_17 : i32
      %32 = tpu.iota {dimensions = array<i32: 1>} : vector<16x8xi32>
      %33 = vector.broadcast %31 : i32 to vector<16x8xi32>
      %34 = arith.addi %33, %32 : vector<16x8xi32>
      %c8_i32_18 = arith.constant 8 : i32
      %35 = arith.muli %1, %c8_i32_18 : i32
      %c0_19 = arith.constant 0 : index
      %c0_20 = arith.constant 0 : index
      %36 = vector.load %arg13[%c0_19, %c0_20] : memref<16x1xi32, #tpu.memory_space<vmem>>, vector<16x1xi32>
      %37 = vector.broadcast %35 : i32 to vector<16x1xi32>
      %38 = arith.addi %37, %36 : vector<16x1xi32>
      %c0_i32_21 = arith.constant 0 : i32
      %39 = vector.broadcast %c0_i32_21 : i32 to vector<16x1xi32>
      %40 = arith.addi %38, %39 : vector<16x1xi32>
      %41 = vector.broadcast %40 : vector<16x1xi32> to vector<16x8xi32>
      %42 = arith.cmpi sgt, %34, %41 : vector<16x8xi32>
      %cst_22 = arith.constant -1.000000e+04 : f32
      %43 = vector.broadcast %cst_22 : f32 to vector<16x8xf32>
      %44 = arith.select %42, %43, %30 : vector<16x8xi1>, vector<16x8xf32>
      %c0_23 = arith.constant 0 : index
      %c0_24 = arith.constant 0 : index
      %45 = vector.load %arg9[%c0_23, %c0_24] : memref<16x1xf32, #tpu.memory_space<vmem>>, vector<16x1xf32>
      %cst_25 = arith.constant dense<0xFF800000> : vector<16xf32>
      %46 = vector.multi_reduction <maximumf>, %44, %cst_25 [1] : vector<16x8xf32> to vector<16xf32>
      %47 = vector.shape_cast %46 : vector<16xf32> to vector<16x1xf32>
      %48 = arith.maximumf %45, %47 : vector<16x1xf32>
      %49 = arith.subf %45, %48 : vector<16x1xf32>
      %50 = math.exp %49 : vector<16x1xf32>
      %51 = vector.broadcast %48 : vector<16x1xf32> to vector<16x8xf32>
      %52 = arith.subf %44, %51 : vector<16x8xf32>
      %53 = math.exp %52 : vector<16x8xf32>
      %c0_26 = arith.constant 0 : index
      %c0_27 = arith.constant 0 : index
      %54 = vector.load %arg10[%c0_26, %c0_27] : memref<16x1xf32, #tpu.memory_space<vmem>>, vector<16x1xf32>
      %55 = arith.mulf %50, %54 : vector<16x1xf32>
      %cst_28 = arith.constant dense<0.000000e+00> : vector<16xf32>
      %56 = vector.multi_reduction <add>, %53, %cst_28 [1] : vector<16x8xf32> to vector<16xf32>
      %57 = vector.shape_cast %56 : vector<16xf32> to vector<16x1xf32>
      %58 = arith.addf %55, %57 : vector<16x1xf32>
      %c0_29 = arith.constant 0 : index
      %c0_30 = arith.constant 0 : index
      %59 = vector.load %arg10[%c0_29, %c0_30] : memref<16x1xf32, #tpu.memory_space<vmem>>, vector<16x1xf32>
      tpu.vector_store %arg10[%c0_29, %c0_30], %58 {strides = array<i32>} : memref<16x1xf32, #tpu.memory_space<vmem>>, vector<16x1xf32>,
      %c0_31 = arith.constant 0 : index
      %c0_32 = arith.constant 0 : index
      %60 = vector.load %arg11[%c0_31, %c0_32] : memref<16x32xf32, #tpu.memory_space<vmem>>, vector<16x32xf32>
      %61 = vector.broadcast %50 : vector<16x1xf32> to vector<16x32xf32>
      %62 = arith.mulf %61, %60 : vector<16x32xf32>
      %cst_33 = arith.constant dense<0.000000e+00> : vector<16x32xf32>
      %63 = tpu.matmul %53, %29, %cst_33 {dimension_numbers = #tpu.dot_dimension_numbers<[1], [0], [0], [1], [0, 0, 1, 1], [], []>} : vector<16x8xf32>, vector<8x32xf32>, vector<16x32xf32> -> vector<16x32xf32>
      %64 = arith.addf %62, %63 : vector<16x32xf32>
      %c0_34 = arith.constant 0 : index
      %c0_35 = arith.constant 0 : index
      %65 = vector.load %arg11[%c0_34, %c0_35] : memref<16x32xf32, #tpu.memory_space<vmem>>, vector<16x32xf32>
      tpu.vector_store %arg11[%c0_34, %c0_35], %64 {strides = array<i32>} : memref<16x32xf32, #tpu.memory_space<vmem>>, vector<16x32xf32>,
      %c0_36 = arith.constant 0 : index
      %c0_37 = arith.constant 0 : index
      %66 = vector.load %arg9[%c0_36, %c0_37] : memref<16x1xf32, #tpu.memory_space<vmem>>, vector<16x1xf32>
      tpu.vector_store %arg9[%c0_36, %c0_37], %48 {strides = array<i32>} : memref<16x1xf32, #tpu.memory_space<vmem>>, vector<16x1xf32>,
    } else {
    }
    %23 = arith.extui %6 : i1 to i32
    %c0_i32_6 = arith.constant 0 : i32
    %24 = arith.cmpi ne, %23, %c0_i32_6 : i32
    scf.if %24 {
      %c0 = arith.constant 0 : index
      %c0_7 = arith.constant 0 : index
      %25 = vector.load %arg10[%c0, %c0_7] : memref<16x1xf32, #tpu.memory_space<vmem>>, vector<16x1xf32>
      %cst = arith.constant 0.000000e+00 : f32
      %26 = vector.broadcast %cst : f32 to vector<16x1xf32>
      %27 = arith.cmpf oeq, %25, %26 : vector<16x1xf32>
      %cst_8 = arith.constant 1.000000e+00 : f32
      %28 = vector.broadcast %cst_8 : f32 to vector<16x1xf32>
      %29 = arith.select %27, %28, %25 : vector<16x1xi1>, vector<16x1xf32>
      %cst_9 = arith.constant 1.000000e+00 : f32
      %30 = vector.broadcast %cst_9 : f32 to vector<16x1xf32>
      %31 = arith.divf %30, %29 : vector<16x1xf32>
      %c0_10 = arith.constant 0 : index
      %c0_11 = arith.constant 0 : index
      %32 = vector.load %arg11[%c0_10, %c0_11] : memref<16x32xf32, #tpu.memory_space<vmem>>, vector<16x32xf32>
      %33 = vector.broadcast %31 : vector<16x1xf32> to vector<16x32xf32>
      %34 = arith.mulf %32, %33 : vector<16x32xf32>
      %35 = vector.extract_strided_slice %34 {offsets = [0, 0], sizes = [8, 32], strides = [1, 1]} : vector<16x32xf32> to vector<8x32xf32>
      %c0_12 = arith.constant 0 : index
      %c0_13 = arith.constant 0 : index
      %c0_14 = arith.constant 0 : index
      %c0_15 = arith.constant 0 : index
      %36 = vector.load %arg8[%c0_12, %c0_13, %c0_14, %c0_15] : memref<1x2x8x32xf32, #tpu.memory_space<vmem>>, vector<1x1x8x32xf32>
      %37 = vector.shape_cast %36 : vector<1x1x8x32xf32> to vector<8x32xf32>
      %38 = vector.shape_cast %35 : vector<8x32xf32> to vector<1x1x8x32xf32>
      tpu.vector_store %arg8[%c0_12, %c0_13, %c0_14, %c0_15], %38 {strides = array<i32>} : memref<1x2x8x32xf32, #tpu.memory_space<vmem>>, vector<1x1x8x32xf32>,
      %39 = vector.extract_strided_slice %34 {offsets = [8, 0], sizes = [8, 32], strides = [1, 1]} : vector<16x32xf32> to vector<8x32xf32>
      %c0_16 = arith.constant 0 : index
      %c1 = arith.constant 1 : index
      %c0_17 = arith.constant 0 : index
      %c0_18 = arith.constant 0 : index
      %40 = vector.load %arg8[%c0_16, %c1, %c0_17, %c0_18] : memref<1x2x8x32xf32, #tpu.memory_space<vmem>>, vector<1x1x8x32xf32>
      %41 = vector.shape_cast %40 : vector<1x1x8x32xf32> to vector<8x32xf32>
      %42 = vector.shape_cast %39 : vector<8x32xf32> to vector<1x1x8x32xf32>
      tpu.vector_store %arg8[%c0_16, %c1, %c0_17, %c0_18], %42 {strides = array<i32>} : memref<1x2x8x32xf32, #tpu.memory_space<vmem>>, vector<1x1x8x32xf32>,
    } else {
    }
    return
  }
  func.func @transform_0(%arg0: i32, %arg1: i32, %arg2: i32, %arg3: memref<1xi32, #tpu.memory_space<smem>>, %arg4: memref<1xi32, #tpu.memory_space<smem>>, %arg5: memref<1xi32, #tpu.memory_space<smem>>) -> (i32, i32, i32, i32) {
    %0 = arith.index_cast %arg2 : i32 to index
    %1 = memref.load %arg3[%0] : memref<1xi32, #tpu.memory_space<smem>>
    %c0_i32 = arith.constant 0 : i32
    %c0_i32_0 = arith.constant 0 : i32
    return %arg0, %arg1, %1, %c0_i32 : i32, i32, i32, i32
  }
  func.func @transform_1(%arg0: i32, %arg1: i32, %arg2: i32, %arg3: memref<1xi32, #tpu.memory_space<smem>>, %arg4: memref<1xi32, #tpu.memory_space<smem>>, %arg5: memref<1xi32, #tpu.memory_space<smem>>) -> (i32, i32, i32, i32, i32) {
    %0 = arith.index_cast %arg2 : i32 to index
    %1 = memref.load %arg4[%0] : memref<1xi32, #tpu.memory_space<smem>>
    %c0_i32 = arith.constant 0 : i32
    %c0_i32_0 = arith.constant 0 : i32
    %c0_i32_1 = arith.constant 0 : i32
    return %arg0, %c0_i32, %arg1, %1, %c0_i32_0 : i32, i32, i32, i32, i32
  }
  func.func @transform_2(%arg0: i32, %arg1: i32, %arg2: i32, %arg3: memref<1xi32, #tpu.memory_space<smem>>, %arg4: memref<1xi32, #tpu.memory_space<smem>>, %arg5: memref<1xi32, #tpu.memory_space<smem>>) -> (i32, i32, i32, i32) {
    %0 = arith.index_cast %arg2 : i32 to index
    %1 = memref.load %arg3[%0] : memref<1xi32, #tpu.memory_space<smem>>
    %c0_i32 = arith.constant 0 : i32
    %c0_i32_0 = arith.constant 0 : i32
    return %arg0, %arg1, %1, %c0_i32 : i32, i32, i32, i32
  }
}

</mosaic_0001>

<bundles_post_ra>
// kernel: tpu_custom_call.1
= control target key start
LH: loop header
LB: loop body
LE: loop exit
PB: predicated region body
PF: predicated region fallthrough
CT: control target
= control target key end

     0   :  { %s1908_s0 = inlined_call_operand.<no memory space> [shape: s32[1], index: 0, kind: input, shape index: {}]   ;;  %s1909_s1 = inlined_call_operand.<no memory space> [shape: s32[1], index: 1, kind: input, shape index: {}]   ;;  %s1910_s2 = inlined_call_operand.<no memory space> [shape: s32[1], index: 2, kind: input, shape index: {}]   ;;  %s1911_s3 = inlined_call_operand.hbm [shape: f32[2,4,8,32], index: 3, kind: input, shape index: {}]   ;;  %s1912_s4 = inlined_call_operand.hbm [shape: f32[2,2,2,8,32], index: 4, kind: input, shape index: {}]   ;;  %s1913_s5 = inlined_call_operand.hbm [shape: f32[2,4,8,32], index: 5, kind: output, shape index: {}]  }
   0x1   :  { %1929 = sst [smem:[#allocation29_spill]] %s1913_s5 }
   0x2   :  { %10 = sst [smem:[#allocation8]] %s1908_s0 }
   0x3   :  { %11 = sst [smem:[#allocation9]] %s1909_s1 }
   0x4   :  { %12 = sst [smem:[#allocation10]] %s1910_s2 }
   0x5   :  { %13 = vsyncpa [#allocation12], 0 }
   0x6   :  { %15 = vsyncpa [#allocation12 + $0x1], 0 }
   0x7   :  { %16 = vsyncpa [#allocation15], 0 }
   0x8   :  { %18 = vsyncpa [#allocation15 + $0x1], 0 }
   0x9   :  { %19 = vsyncpa [#allocation13], 0 }
   0xa   :  { %21 = vsyncpa [#allocation13 + $0x1], 0  ;;  %s1467_s24 = smov 0   ;;  %s1469_s25 = smov 0  }
   0xb   :  { %s1471_s26 = smov 0   ;;  %s1473_s0 = smov 0  }
   0xc   :  { %s1475_s27 = smov 0   ;;  %s1477_s1 = smov 0  }
   0xd   :  { %s1479_s28 = smov 0   ;;  %s1481_s2 = smov 0  }
   0xe   :  { %s1483_s29 = smov 0   ;;  %s1485_s30 = smov 0  }
   0xf   :  { %s1487_s6 = smov 0   ;;  %s1489_s7 = smov 0  }
  0x10   :  { %s1491_s8 = smov 0   ;;  %s1493_s9 = smov 0  }
  0x11 LB: > { %1930 = sst [smem:[#allocation20_spill]] %s1361_s24  ;;  %s965_s10 = sadd.s32 4294967295, %s1413_s9   ;;  %s1413_s9 = sphi %s1493_s9, %s27_s9   ;;  %s1409_s8 = sphi %s1491_s8, %s1981_s8   ;;  %s1405_s7 = sphi %s1489_s7, %s1980_s7   ;;  %s1401_s6 = sphi %s1487_s6, %s1979_s6   ;;  %s1397_s30 = sphi %s1485_s30, %s1978_s30   ;;  %s1393_s29 = sphi %s1483_s29, %s1977_s29   ;;  %s1389_s2 = sphi %s1481_s2, %s1976_s2   ;;  %s1385_s28 = sphi %s1479_s28, %s1975_s28   ;;  %s1381_s1 = sphi %s1477_s1, %s1974_s1   ;;  %s1377_s27 = sphi %s1475_s27, %s1973_s27   ;;  %s1373_s0 = sphi %s1473_s0, %s1972_s0   ;;  %s1369_s26 = sphi %s1471_s26, %s1971_s26   ;;  %s1365_s25 = sphi %s1469_s25, %s1970_s25   ;;  %s1361_s24 = sphi %s1467_s24, %s1965_s24  }
  0x12   : > { %1931 = sst [smem:[#allocation21_spill]] %s1365_s25  ;;  %s42_s11 = sadd.s32 1, %s1405_s7 }
  0x13   : > { %1932 = sst [smem:[#allocation22_spill]] %s1397_s30  ;;  %s46_s12 = sadd.s32 1, %s1409_s8 }
  0x14   : > { %1933 = sst [smem:[#allocation23_spill]] %s1401_s6  ;;  %p44_p0 = scmp.ge.s32.totalorder %s42_s11, 2 }
  0x15   : > { %s1538_s13 = sld [smem:[#allocation8]]  ;;  %s966_s14 = sadd.s32 4294967294, %s1413_s9  }
  0x16   : > { %s59_s15 = sadd.s32 1, %s1393_s29  ;;  %s1983_s11 = smov (%p44_p0, %s42_s11), 0 }
  0x17   : > { %1934 = sst [smem:[#allocation24_spill]] %s1983_s11  ;;  %s1985_s12 = smov (!%p44_p0, %s46_s12), %s1409_s8 }
  0x18   : > { %s53_s16 = ssub.s32 %s1405_s7, %s1983_s11  ;;  %p66_p1 = scmp.ne.s32.totalorder %s1393_s29, %s1389_s2 }
  0x19   : > { %p48_p2 = scmp.ge.s32.totalorder %s1985_s12, 2  ;;  %p1924_p3 = scmp.eq.s32.totalorder %s1413_s9, 0 }
  0x1a   : > { %p72_p4 = scmp.ne.s32.totalorder %s1389_s2, %s1385_s28  ;;  %p1553_p5 = scmp.eq.s32.totalorder %s965_s10, 0 }
  0x1b   : > { %s1987_s12 = smov (%p48_p2, %s1985_s12), 0  ;;  %s1557_s18 = sld [smem:[#allocation9]] }
  0x1c   : > { %1935 = sst [smem:[#allocation25_spill]] %s1987_s12  ;;  %s52_s19 = ssub.s32 %s1409_s8, %s1987_s12 }
  0x1d   : > { %s123_s20 = sadd.s32 1, %s1369_s26  ;;  %s1562_s21 = sor.u32 %s53_s16, %s52_s19 }
  0x1e   : > { %p1566_p6 = por %p1553_p5, %p72_p4  ;;  %p133_p7 = scmp.ne.s32.totalorder %s1369_s26, %s1365_s25 }
  0x1f   : > { %p1925_p8 = scmp.eq.s32.totalorder %s1562_s21, 0  ;;  %p134_p9 = scmp.eq.s32.totalorder %s965_s10, 3 }
  0x20   : > { %s1937_s22 = scalar_select %p1566_p6, 1, 0 }
  0x21   : > { %p139_p10 = scmp.ne.s32.totalorder %s1365_s25, %s1361_s24  ;;  %p140_p11 = scmp.eq.s32.totalorder %s966_s14, 3 }
  0x22   : > { %s1578_s23 = scalar_select %p1925_p8, %s1393_s29, %s59_s15  }
  0x23   : > { %p1580_p12 = por %p134_p9, %p133_p7  ;;  %p1589_p13 = por %p1924_p3, %p66_p1 }
  0x24   : > { %1938 = sst [smem:[#allocation26_spill]] %s1578_s23  ;;  %p1593_p0 = por %p140_p11, %p139_p10 }
  0x25   : > { %s1939_s28 = scalar_select %p1580_p12, 1, 0 }
  0x26   : > { %s1942_s10 = scalar_select %p1593_p0, 1, 0 }
  0x27   : > { %1940 = sst [smem:[#allocation27_spill]] %s1939_s28  ;;  %p1923_p2 = scmp.lt.s32.totalorder %s1413_s9, 4 }
  0x28   : > { %1943 = sst [smem:[#allocation28_spill]] %s1942_s10  ;;  %s160_s15 = sand.u32 1, %s1393_s29  }
  0x29   : > { %s1600_s14 = scalar_select %p1925_p8, %s1369_s26, %s123_s20  }
  0x2a   : > { %s969_s19 = sshll.u32 %s160_s15, 4  ;;  %s970_s12 = sshll.u32 %s1405_s7, 1 }
  0x2b   : > { %s170_s11 = sadd.s32 %s970_s12, %s1538_s13  ;;  %s971_s23 = sshll.u32 %s1409_s8, 2 }
  0x2c   : > { %s172_s24 = sadd.s32 %s971_s23, %s170_s11  ;;  %s164_s5 = scalar_lea.vmem [#allocation11], %s969_s19 }
  0x2d   : > { %s175_s28 = sshll.u32 %s164_s5, 4  ;;  %s972_s6 = sshll.u32 %s172_s24, 7  ;;  %s1609_s28 = int_to_ptr.vmem [resolvable:$true] %s175_s28 }
  0x2e   : > { %s1614_s10 = scalar_lea.hbm %s1911_s3, %s972_s6  ;;  %p1620_p1 = pnand %p1923_p2, %p1589_p13 }
  0x2f   : > { %s194_s5 = sadd.s32 %s1405_s7, %s1557_s18  ;;  %s1626_s24 = scalar_lea.sflag [#allocation12], %s160_s15 }
  0x30   : > { %s1203_s11 = scalar_lea.hbm %s1614_s10, 256  ;;  %p1205_p7 = pneg %p1620_p1 }
  0x31   : > { %p1204_p4 = scmp.ne.s32.totalorder %s1614_s10, %s1203_s11  ;;  %s1208_s6 = scalar_lea.hbm %s1911_s3, 1024 }
  0x32   : > { %p1209_p11 = scmp.lt.u32.totalorder %s1614_s10, %s1911_s3  ;;  %p1210_p13 = scmp.lt.u32.totalorder %s1208_s6, %s1203_s11 }
  0x33   : > { %p1206_p9 = pnand %p1205_p7, %p1204_p4  ;;  %p1212_p3 = scmp.lt.u32.totalorder %s1203_s11, %s1614_s10 }
  0x34   : > { %p1211_p2 = por %p1210_p13, %p1209_p11 }
  0x35   : > { %p1207_p10 = pneg %p1206_p9 }
  0x36   : > { %p1213_p8 = por %p1212_p3, %p1211_p2 }
  0x38   : > { %p1214_p0 = pnand %p1213_p8, %p1207_p10 }
  0x3a   : > { %1217 = shalt.err (!%p1214_p0)
}
  0x3b   : > { %s1218_s16 = scalar_lea.vmem %s1609_s28, 256  ;;  %s1415_s15 = smov [#allocation11]  }
  0x3c   : > { %p1219_p4 = scmp.ne.s32.totalorder %s1609_s28, %s1218_s16  ;;  %s1223_s19 = sshll.u32 %s1415_s15, 4  ;;  %s1224_s19 = int_to_ptr.vmem [resolvable:$false] %s1223_s19 }
  0x3d   : > { %s1225_s25 = scalar_lea.vmem %s1224_s19, 512  ;;  %p1226_p6 = scmp.lt.s32.totalorder %s1609_s28, %s1224_s19 }
  0x3e   : > { %p1221_p9 = pnand %p1219_p4, %p1205_p7  ;;  %p1227_p11 = scmp.lt.s32.totalorder %s1225_s25, %s1218_s16 }
  0x40   : > { %p1222_p12 = pneg %p1221_p9  ;;  %p1228_p13 = por %p1227_p11, %p1226_p6 }
  0x42   : > { %p1229_p3 = pnand %p1228_p13, %p1222_p12 }
  0x44   : > { %1232 = shalt.err (!%p1229_p3)
}
  0x45   : > { %s1416_s11 = smov 128   ;;  %s1417_s30 = smov 8  }
  0x46   : > { %1046 = dma.hbm_to_vmem [thread:$0]  (!%p1620_p1), %s1614_s10, 256, %s1609_s28, %s1626_s24, %s1416_s11, %s1416_s11, %s1417_s30  }
  0x47   : > { %s196_s6 = sadd.s32 %s971_s23, %s194_s5  ;;  %p976_p6 = scmp.ge.s32.totalorder %s1413_s9, 1 }
  0x48   : > { %p207_p8 = scmp.lt.s32.totalorder %s1413_s9, 5  ;;  %s975_s13 = sshll.u32 %s196_s6, 7 }
  0x49   : > { %s91_s16 = sadd.s32 1, %s1381_s1  ;;  %p98_p0 = scmp.ne.s32.totalorder %s1381_s1, %s1377_s27 }
  0x4a   : > { %p1664_p12 = pnand %p976_p6, %p207_p8  ;;  %p1946_p2 = scmp.eq.s32.totalorder %s1562_s21, 0 }
  0x4b   : > { %p1947_p7 = scmp.eq.s32.totalorder %s1413_s9, 0  ;;  %p104_p4 = scmp.ne.s32.totalorder %s1377_s27, %s1373_s0 }
  0x4c   : > { %s1674_s15 = scalar_select %p1946_p2, %s1381_s1, %s91_s16  }
  0x4d   : > { %p100_p10 = por %p98_p0, %p1947_p7  ;;  %s1683_s18 = scalar_lea.hbm %s1912_s4, %s975_s13 }
  0x4e   : > { %s185_s23 = sand.u32 1, %s1381_s1   ;;  %p1688_p1 = por %p104_p4, %p1553_p5 }
  0x4f   : > { %s973_s21 = sshll.u32 %s185_s23, 4  ;;  %p1949_p9 = scmp.lt.s32.totalorder %s1413_s9, 4 }
  0x50   : > { %s1948_s10 = scalar_select %p1688_p1, 1, 0 }
  0x51   : > { %p1694_p11 = pnand %p1949_p9, %p100_p10  ;;  %s189_s0 = scalar_lea.vmem [#allocation14], %s973_s21 }
  0x52   : > { %s199_s24 = sshll.u32 %s189_s0, 4  ;;  %s1700_s19 = scalar_lea.sflag [#allocation15], %s185_s23  ;;  %s1698_s24 = int_to_ptr.vmem [resolvable:$true] %s199_s24 }
  0x53   : > { %s1233_s17 = scalar_lea.hbm %s1683_s18, 256  ;;  %p1235_p13 = pneg %p1694_p11 }
  0x54   : > { %p1234_p5 = scmp.ne.s32.totalorder %s1683_s18, %s1233_s17  ;;  %s1238_s13 = scalar_lea.hbm %s1912_s4, 1024 }
  0x55   : > { %p1239_p8 = scmp.lt.u32.totalorder %s1683_s18, %s1912_s4  ;;  %p1240_p0 = scmp.lt.u32.totalorder %s1238_s13, %s1233_s17 }
  0x56   : > { %p1236_p3 = pnand %p1235_p13, %p1234_p5  ;;  %p1242_p7 = scmp.lt.u32.totalorder %s1233_s17, %s1683_s18 }
  0x57   : > { %p1241_p2 = por %p1240_p0, %p1239_p8 }
  0x58   : > { %p1237_p6 = pneg %p1236_p3 }
  0x59   : > { %p1243_p10 = por %p1242_p7, %p1241_p2 }
  0x5b   : > { %p1244_p4 = pnand %p1243_p10, %p1237_p6 }
  0x5d   : > { %1247 = shalt.err (!%p1244_p4)
}
  0x5e   : > { %s1248_s28 = scalar_lea.vmem %s1698_s24, 256  ;;  %s1418_s23 = smov [#allocation14]  }
  0x5f   : > { %p1249_p9 = scmp.ne.s32.totalorder %s1698_s24, %s1248_s28  ;;  %s1253_s21 = sshll.u32 %s1418_s23, 4  ;;  %s1254_s21 = int_to_ptr.vmem [resolvable:$false] %s1253_s21 }
  0x60   : > { %s1255_s0 = scalar_lea.vmem %s1254_s21, 512  ;;  %p1256_p1 = scmp.lt.s32.totalorder %s1698_s24, %s1254_s21 }
  0x61   : > { %p1251_p5 = pnand %p1249_p9, %p1235_p13  ;;  %p1257_p8 = scmp.lt.s32.totalorder %s1255_s0, %s1248_s28 }
  0x63   : > { %p1252_p3 = pneg %p1251_p5  ;;  %p1258_p0 = por %p1257_p8, %p1256_p1 }
  0x65   : > { %p1259_p2 = pnand %p1258_p0, %p1252_p3 }
  0x67   : > { %1262 = shalt.err (!%p1259_p2)
}
  0x68   : > { %s1419_s17 = smov 256   ;;  %211 = sbr.rel (%p1664_p12) target bundleno = 1773 (0x6ed), region = 28 }
  0x69   : > { %1049 = dma.hbm_to_vmem [thread:$0]  (!%p1694_p11), %s1683_s18, 256, %s1698_s24, %s1700_s19, %s1419_s17, %s1416_s11, %s1417_s30  }
  0x6a   : > { %s213_s25 = sand.u32 (!%p1664_p12), 1, %s1389_s2   ;;  %p1951_p1 = scmp.ne.s32.totalorder (!%p1664_p12), %s1937_s22, 0 }
  0x6b   : > { %s977_s6 = sshll.u32 (!%p1664_p12), %s213_s25, 4  ;;  %s214_s13 = scalar_lea.sflag (!%p1664_p12), [#allocation12], %s213_s25 }
  0x6c   : > { %s217_s16 = scalar_lea.vmem (!%p1664_p12), [#allocation11], %s977_s6 }
  0x6f   : > { %1348 = dma.done.wait (%p1951_p1), %s214_s13, 256  }
  0x70   : > { %1350 = vsyncadd (%p1951_p1), %s214_s13, 4294967040  ;;  %s222_s5 = sand.u32 1, %s1377_s27   ;;  %p1952_p11 = scmp.ne.s32.totalorder %s1948_s10, 0 }
  0x71   : > { %s978_s12 = sshll.u32 %s222_s5, 4  ;;  %s223_s28 = scalar_lea.sflag [#allocation15], %s222_s5 }
  0x72   : > { %s1738_s11 = scalar_lea.vmem [#allocation14], %s978_s12 }
  0x73   : > { %1352 = dma.done.wait (%p1952_p11), %s223_s28, 256  }
  0x74   : > { %1354 = vsyncadd (%p1952_p11), %s223_s28, 4294967040  ;;  %s1953_s30 = sld [smem:[#allocation21_spill]]  ;;  %s257_s18 = sld [smem:[#allocation8]] }
  0x75   : > { %s258_s24 = sld [smem:[#allocation9]] }
  0x76   : > { %s1745_s19 = sld [smem:[#allocation10]] }
  0x7a   : > { %s249_s20 = sand.u32 1, %s1953_s30  }
  0x7b   : > { %s979_s22 = sshll.u32 %s249_s20, 4  ;;  %p980_p12 = scmp.ne.s32.totalorder %s258_s24, 0 }
  0x7c   : > { %s1749_s23 = scalar_lea.vmem [#allocation16], %s979_s22  ;;  %vm265_vm0 = vcmask (!%p980_p12), 7168   ;;  %vm270_vm1 = vcmask (!%p980_p12), 261120   ;;  %v273_v0 = vld [vmem:[%s217_s16] sm:$0xff] (!%p980_p12)  ;;  %v981_v1 = vld [vmem:[%s217_s16 + $0x8] sm:$0xff] (!%p980_p12)  ;;  %v1420_v2 = vmov (!%p980_p12), -inf   ;;  %v276_v5 = vlaneseq (!%p980_p12) }
  0x7d   : > { %264 = sbr.rel (%p980_p12) target bundleno = 132 (0x84), region = 40  ;;  %266 = vst.msk [vmem:[#allocation2] sm:$0xff] (!%p980_p12), %vm265_vm0, %v1420_v2  ;;  %267 = vst.msk [vmem:[#allocation2 + $0x8] sm:$0xff] (!%p980_p12), %vm265_vm0, %v1420_v2  ;;  %v1421_v3 = vmov (!%p980_p12), 0.0   ;;  %v274_v4 = vmul.f32 (!%p980_p12), 0.17677669, %v273_v0 }
  0x7e   : > { %268 = vst.msk [vmem:[#allocation3] sm:$0xff] (!%p980_p12), %vm265_vm0, %v1421_v3  ;;  %269 = vst.msk [vmem:[#allocation3 + $0x8] sm:$0xff] (!%p980_p12), %vm265_vm0, %v1421_v3  ;;  %v281_v6 = vmul.f32 (!%p980_p12), 0.17677669, %v981_v1  ;;  %v277_v7 = vshrl.u32 (!%p980_p12), %v276_v5, 7 }
  0x7f   : > { %271 = vst.msk [vmem:[#allocation4] sm:$0xff] (!%p980_p12), %vm270_vm1, %v1421_v3  ;;  %272 = vst.msk [vmem:[#allocation4 + $0x8] sm:$0xff] (!%p980_p12), %vm270_vm1, %v1421_v3 }
  0x80   : > { %275 = vst.msk [vmem:[#allocation5] sm:$0xff] (!%p980_p12), %vm270_vm1, %v274_v4  ;;  %282 = vst.msk [vmem:[#allocation5 + $0x8] sm:$0xff] (!%p980_p12), %vm270_vm1, %v281_v6 }
  0x81   : > { %278 = vst.msk [vmem:[#allocation6] sm:$0xff] (!%p980_p12), %vm265_vm0, %v277_v7  ;;  %283 = vst.msk [vmem:[#allocation6 + $0x8] sm:$0xff] (!%p980_p12), %vm265_vm0, %v277_v7 }
  0x84 PF: > { %s1761_s10 = sshll.u32 %s257_s18, 3  ;;  %s1763_s21 = sshll.u32 %s258_s24, 3 }
  0x85   : > { %s285_s0 = sadd.s32 7, %s1761_s10  ;;  %s287_s17 = sadd.s32 7, %s1763_s21 }
  0x86   : > { %p1768_p13 = scmp.gt.s32.totalorder %s287_s17, %s1761_s10 }
  0x87   : > { %v294_v8 = vld [vmem:[%s1738_s11] sm:$0xff] (!%p1768_p13)  ;;  %vm297_vm2 = vcmask (!%p1768_p13), 261120   ;;  %v293_v10 = vld [vmem:[#allocation5 + $0x8] sm:$0xff] (!%p1768_p13)  ;;  %vm384_vm3 = vcmask (!%p1768_p13), 64512   ;;  %v1422_v15 = vmov (!%p1768_p13), 0   ;;  %vm427_vm4 = vcmask (!%p1768_p13), 7168  }
  0x88   : > { %291 = sbr.rel (%p1768_p13) target bundleno = 861 (0x35d), region = 44  ;;  %v292_v9 = vld [vmem:[#allocation5] sm:$0xff] (!%p1768_p13)  ;;  %1017 = vmatprep.subr.msk.mxu0 (!%p1768_p13), %vm297_vm2, %v294_v8  ;;  %1178 = vset.pattern.permute.xlu1 (!%p1768_p13), %v1422_v15  ;;  %v382_v16 = vld [vmem:[#allocation2] sm:$0xff] (!%p1768_p13)  ;;  %v383_v19 = vld [vmem:[#allocation2 + $0x8] sm:$0xff] (!%p1768_p13) }
  0x89   : > { %1019 = vmatprep.mubr.msk.f32.mxu0 (!%p1768_p13), %vm297_vm2, %v292_v9  ;;  %1018 = vmatpush3.xpose.msk.msra.mxu0 (!%p1768_p13), %vm297_vm2, %v294_v8  ;;  %v985_v24 = vld [vmem:[%s1738_s11 + $0x8] sm:$0xff] (!%p1768_p13)  ;;  %v415_v39 = vld [vmem:[#allocation3] sm:$0xff] (!%p1768_p13)  ;;  %v430_v49 = vld [vmem:[#allocation4] sm:$0xff] (!%p1768_p13) }
  0x8a   : > { %1179 = vset.pattern.permute.xlu0 (!%p1768_p13), %v1422_v15  ;;  %1022 = vmatprep.subr.mxu1 (!%p1768_p13), %v985_v24  ;;  %v416_v42 = vld [vmem:[#allocation3 + $0x8] sm:$0xff] (!%p1768_p13)  ;;  %v431_v47 = vld [vmem:[#allocation4 + $0x8] sm:$0xff] (!%p1768_p13) }
  0x8b   : > { %1023 = vmatpush3.msra.mxu1 (!%p1768_p13), %v985_v24 }
  0x8c   : > { %1020 = vmatmul.mubr.msk.f32.vlgmr.msra.gmra.mrb[0].mxu0 (!%p1768_p13), %vm297_vm2, %v293_v10 }
 0x15f   : > { %v1021_v11 = vpop.f32.mrb[0].mxu0 }
 0x160   : > { %v373_v12 = vpop.f32.mrb[1].mxu0  ;;  %v388_v14 = vsel %vm384_vm3, %v1021_v11, -inf }
 0x161   : > { %v385_v13 = vsel %vm384_vm3, %v373_v12, -inf }
 0x162   : > { %386 = vmax.xlane.f32.xlu0 %v385_v13 }
 0x166   : > { %389 = vmax.xlane.f32.xlu0 %v388_v14 }
 0x1ef   : > { %v387_v17 = vpop.xlane.xlu0 %386 }
 0x1f0   : > { %v391_v18 = vmax.f32 %v382_v16, %v387_v17 }
 0x1f2   : > { %v393_v20 = vsub.f32 %v382_v16, %v391_v18  ;;  %529 = vst.msk [vmem:[#allocation2] sm:$0xff] %vm427_vm4, %v391_v18  ;;  %401 = vperm.xlu1 %1178, %v391_v18  }
 0x1f3   : > { %v390_v21 = vpop.xlane.xlu0 %389 }
 0x1f4   : > { %v392_v22 = vmax.f32 %v383_v19, %v390_v21  ;;  %v395_v36 = vmul.f32 1.442695, %v393_v20 }
 0x1f6   : > { %v394_v23 = vsub.f32 %v383_v19, %v392_v22  ;;  %530 = vst.msk [vmem:[#allocation2 + $0x8] sm:$0xff] %vm427_vm4, %v392_v22  ;;  %406 = vperm.xlu1 %1178, %v392_v22  }
 0x1f8   : > { %v397_v35 = vmul.f32 1.442695, %v394_v23 }
 0x271   : > { %v402_v25 = vpop.permute.xlu1 %401 }
 0x272   : > { %v409_v26 = vsub.f32 %v373_v12, %v402_v25 }
 0x274   : > { %v411_v27 = vmul.f32 1.442695, %v409_v26 }
 0x275   : > { %v407_v28 = vpop.permute.xlu1 %406 }
 0x276   : > { %1180 = vpow2.f32 %v411_v27  ;;  %v410_v29 = vsub.f32 %v1021_v11, %v407_v28 }
 0x278   : > { %v413_v30 = vmul.f32 1.442695, %v410_v29 }
 0x27a   : > { %1182 = vpow2.f32 %v413_v30 }
 0x27b   : > { %1184 = vpow2.f32 %v397_v35 }
 0x27c   : > { %1186 = vpow2.f32 %v395_v36 }
 0x280   : > { %v1181_v31 = vpop.eup %1180 }
 0x281   : > { %1024 = vmatprep.mubr.msk.f32.mxu1 %vm384_vm3, %v1181_v31  ;;  %v419_v32 = vsel %vm384_vm3, %v1181_v31, 0.0 }
 0x282   : > { %420 = vadd.xlane.f32.xlu0 %v419_v32 }
 0x284   : > { %v1183_v33 = vpop.eup %1182 }
 0x285   : > { %1025 = vmatmul.mubr.msk.f32.vlgmr.msra.gmra.mrb[0].mxu1 %vm384_vm3, %v1183_v33  ;;  %v422_v34 = vsel %vm384_vm3, %v1183_v33, 0.0  ;;  %v1185_v37 = vpop.eup %1184 }
 0x286   : > { %423 = vadd.xlane.f32.xlu1 %v422_v34  ;;  %v1187_v38 = vpop.eup %1186  ;;  %v418_v44 = vmul.f32 %v1185_v37, %v416_v42 }
 0x287   : > { %v417_v40 = vmul.f32 %v1187_v38, %v415_v39 }
 0x297   : > { %439 = vperm.xlu1 %1178, %v1185_v37  }
 0x298   : > { %434 = vperm.xlu0 %1179, %v1187_v38  }
 0x30f   : > { %v421_v41 = vpop.xlane.xlu0 %420 }
 0x310   : > { %v425_v43 = vadd.f32 %v421_v41, %v417_v40 }
 0x312   : > { %428 = vst.msk [vmem:[#allocation3] sm:$0xff] %vm427_vm4, %v425_v43 }
 0x313   : > { %v424_v45 = vpop.xlane.xlu1 %423 }
 0x314   : > { %v426_v46 = vadd.f32 %v424_v45, %v418_v44 }
 0x316   : > { %429 = vst.msk [vmem:[#allocation3 + $0x8] sm:$0xff] %vm427_vm4, %v426_v46 }
 0x317   : > { %v440_v48 = vpop.permute.xlu1 %439  ;;  %v435_v50 = vpop.permute.xlu0 %434 }
 0x318   : > { %v443_v51 = vmul.f32 %v440_v48, %v431_v47  ;;  %v442_v52 = vmul.f32 %v435_v50, %v430_v49 }
 0x358   : > { %v1026_v53 = vpop.f32.mrb[0].mxu1 }
 0x359   : > { %v526_v54 = vadd.f32 %v1026_v53, %v443_v51  ;;  %v516_v55 = vpop.f32.mrb[1].mxu1 }
 0x35a   : > { %v525_v56 = vadd.f32 %v516_v55, %v442_v52 }
 0x35b   : > { %528 = vst.msk [vmem:[#allocation4 + $0x8] sm:$0xff] %vm297_vm2, %v526_v54 }
 0x35c   : > { %527 = vst.msk [vmem:[#allocation4] sm:$0xff] %vm297_vm2, %v525_v56 }
 0x35d PF: > { %p531_p6 = scmp.le.s32.totalorder %s1763_s21, %s285_s0 }
 0x35f   : > { %p533_p7 = pnand %p1768_p13, %p531_p6 }
 0x360   : > { %v539_v57 = vld [vmem:[%s1738_s11] sm:$0xff] (!%p533_p7)  ;;  %vm542_vm5 = vcmask (!%p533_p7), 261120   ;;  %v633_v59 = vstv (!%p533_p7), %s1761_s10  ;;  %v632_v61 = vld [vmem:[#allocation6 + $0x8] sm:$0xff] (!%p533_p7)  ;;  %v538_v62 = vld [vmem:[#allocation5 + $0x8] sm:$0xff] (!%p533_p7)  ;;  %v1423_v63 = vmov (!%p533_p7), 0   ;;  %v627_v2 = vlaneseq (!%p533_p7) }
 0x361   : > { %536 = sbr.rel (%p533_p7) target bundleno = 1591 (0x637), region = 48  ;;  %v537_v58 = vld [vmem:[#allocation5] sm:$0xff] (!%p533_p7)  ;;  %1027 = vmatprep.subr.msk.mxu0 (!%p533_p7), %vm542_vm5, %v539_v57  ;;  %v631_v60 = vld [vmem:[#allocation6] sm:$0xff] (!%p533_p7)  ;;  %1188 = vset.pattern.permute.xlu0 (!%p533_p7), %v1423_v63  ;;  %v635_v1 = vadd.s32 (!%p533_p7), %v633_v59, %v632_v61  ;;  %v629_v5 = vstv (!%p533_p7), %s1763_s21  ;;  %vm648_vm7 = vcmask (!%p533_p7), 64512   ;;  %vm691_vm9 = vcmask (!%p533_p7), 7168   ;;  %v647_v17 = vld [vmem:[#allocation2 + $0x8] sm:$0xff] (!%p533_p7) }
 0x362   : > { %1029 = vmatprep.mubr.msk.f32.mxu0 (!%p533_p7), %vm542_vm5, %v537_v58  ;;  %1028 = vmatpush3.xpose.msk.msra.mxu0 (!%p533_p7), %vm542_vm5, %v539_v57  ;;  %v634_v0 = vadd.s32 (!%p533_p7), %v633_v59, %v631_v60  ;;  %v628_v3 = vand.u32 (!%p533_p7), 127, %v627_v2  ;;  %v646_v14 = vld [vmem:[#allocation2] sm:$0xff] (!%p533_p7)  ;;  %v991_v22 = vld [vmem:[%s1738_s11 + $0x8] sm:$0xff] (!%p533_p7)  ;;  %v679_v37 = vld [vmem:[#allocation3] sm:$0xff] (!%p533_p7) }
 0x363   : > { %1189 = vset.pattern.permute.xlu1 (!%p533_p7), %v1423_v63  ;;  %1032 = vmatprep.subr.mxu1 (!%p533_p7), %v991_v22  ;;  %v680_v40 = vld [vmem:[#allocation3 + $0x8] sm:$0xff] (!%p533_p7)  ;;  %v695_v45 = vld [vmem:[#allocation4 + $0x8] sm:$0xff] (!%p533_p7)  ;;  %v694_v47 = vld [vmem:[#allocation4] sm:$0xff] (!%p533_p7) }
 0x364   : > { %637 = vperm.xlu0 (!%p533_p7), %1188, %v634_v0   ;;  %v630_v6 = vadd.s32 (!%p533_p7), %v629_v5, %v628_v3  ;;  %1033 = vmatpush3.msra.mxu1 (!%p533_p7), %v991_v22 }
 0x365   : > { %1030 = vmatmul.mubr.msk.f32.vlgmr.msra.gmra.mrb[0].mxu0 (!%p533_p7), %vm542_vm5, %v538_v62 }
 0x368   : > { %640 = vperm.xlu0 %1188, %v635_v1  }
 0x3e3   : > { %v638_v4 = vpop.permute.xlu0 %637 }
 0x3e4   : > { %vm642_vm6 = vcmp.gt.s32.totalorder %v630_v6, %v638_v4 }
 0x3e7   : > { %v641_v7 = vpop.permute.xlu0 %640 }
 0x3e8   : > { %vm643_vm8 = vcmp.gt.s32.totalorder %v630_v6, %v641_v7 }
 0x438   : > { %v1031_v8 = vpop.f32.mrb[0].mxu0 }
 0x439   : > { %v618_v9 = vpop.f32.mrb[1].mxu0  ;;  %v645_v12 = vsel %vm643_vm8, -10000.0, %v1031_v8 }
 0x43a   : > { %v644_v10 = vsel %vm642_vm6, -10000.0, %v618_v9  ;;  %v652_v13 = vsel %vm648_vm7, %v645_v12, -inf }
 0x43b   : > { %v649_v11 = vsel %vm648_vm7, %v644_v10, -inf }
 0x43c   : > { %650 = vmax.xlane.f32.xlu1 %v649_v11 }
 0x440   : > { %653 = vmax.xlane.f32.xlu1 %v652_v13 }
 0x4c9   : > { %v651_v15 = vpop.xlane.xlu1 %650 }
 0x4ca   : > { %v655_v16 = vmax.f32 %v646_v14, %v651_v15 }
 0x4cc   : > { %v657_v18 = vsub.f32 %v646_v14, %v655_v16  ;;  %793 = vst.msk [vmem:[#allocation2] sm:$0xff] %vm691_vm9, %v655_v16  ;;  %665 = vperm.xlu0 %1188, %v655_v16  }
 0x4cd   : > { %v654_v19 = vpop.xlane.xlu1 %653 }
 0x4ce   : > { %v656_v20 = vmax.f32 %v647_v17, %v654_v19  ;;  %v659_v34 = vmul.f32 1.442695, %v657_v18 }
 0x4d0   : > { %v658_v21 = vsub.f32 %v647_v17, %v656_v20  ;;  %794 = vst.msk [vmem:[#allocation2 + $0x8] sm:$0xff] %vm691_vm9, %v656_v20  ;;  %670 = vperm.xlu1 %1189, %v656_v20  }
 0x4d2   : > { %v661_v33 = vmul.f32 1.442695, %v658_v21 }
 0x54b   : > { %v666_v23 = vpop.permute.xlu0 %665 }
 0x54c   : > { %v673_v24 = vsub.f32 %v644_v10, %v666_v23 }
 0x54e   : > { %v675_v25 = vmul.f32 1.442695, %v673_v24 }
 0x54f   : > { %v671_v26 = vpop.permute.xlu1 %670 }
 0x550   : > { %1190 = vpow2.f32 %v675_v25  ;;  %v674_v27 = vsub.f32 %v645_v12, %v671_v26 }
 0x552   : > { %v677_v28 = vmul.f32 1.442695, %v674_v27 }
 0x554   : > { %1192 = vpow2.f32 %v677_v28 }
 0x555   : > { %1194 = vpow2.f32 %v661_v33 }
 0x556   : > { %1196 = vpow2.f32 %v659_v34 }
 0x55a   : > { %v1191_v29 = vpop.eup %1190 }
 0x55b   : > { %1034 = vmatprep.mubr.msk.f32.mxu1 %vm648_vm7, %v1191_v29  ;;  %v683_v30 = vsel %vm648_vm7, %v1191_v29, 0.0 }
 0x55c   : > { %684 = vadd.xlane.f32.xlu0 %v683_v30 }
 0x55e   : > { %v1193_v31 = vpop.eup %1192 }
 0x55f   : > { %1035 = vmatmul.mubr.msk.f32.vlgmr.msra.gmra.mrb[0].mxu1 %vm648_vm7, %v1193_v31  ;;  %v686_v32 = vsel %vm648_vm7, %v1193_v31, 0.0  ;;  %v1195_v35 = vpop.eup %1194 }
 0x560   : > { %687 = vadd.xlane.f32.xlu1 %v686_v32  ;;  %v1197_v36 = vpop.eup %1196  ;;  %v682_v42 = vmul.f32 %v1195_v35, %v680_v40 }
 0x561   : > { %v681_v38 = vmul.f32 %v1197_v36, %v679_v37 }
 0x571   : > { %703 = vperm.xlu1 %1189, %v1195_v35  }
 0x572   : > { %698 = vperm.xlu0 %1188, %v1197_v36  }
 0x5e9   : > { %v685_v39 = vpop.xlane.xlu0 %684 }
 0x5ea   : > { %v689_v41 = vadd.f32 %v685_v39, %v681_v38 }
 0x5ec   : > { %692 = vst.msk [vmem:[#allocation3] sm:$0xff] %vm691_vm9, %v689_v41 }
 0x5ed   : > { %v688_v43 = vpop.xlane.xlu1 %687 }
 0x5ee   : > { %v690_v44 = vadd.f32 %v688_v43, %v682_v42 }
 0x5f0   : > { %693 = vst.msk [vmem:[#allocation3 + $0x8] sm:$0xff] %vm691_vm9, %v690_v44 }
 0x5f1   : > { %v704_v46 = vpop.permute.xlu1 %703  ;;  %v699_v48 = vpop.permute.xlu0 %698 }
 0x5f2   : > { %v707_v49 = vmul.f32 %v704_v46, %v695_v45  ;;  %v706_v50 = vmul.f32 %v699_v48, %v694_v47 }
 0x632   : > { %v1036_v51 = vpop.f32.mrb[0].mxu1 }
 0x633   : > { %v790_v52 = vadd.f32 %v1036_v51, %v707_v49  ;;  %v780_v53 = vpop.f32.mrb[1].mxu1 }
 0x634   : > { %v789_v54 = vadd.f32 %v780_v53, %v706_v50 }
 0x635   : > { %792 = vst.msk [vmem:[#allocation4 + $0x8] sm:$0xff] %vm542_vm5, %v790_v52 }
 0x636   : > { %791 = vst.msk [vmem:[#allocation4] sm:$0xff] %vm542_vm5, %v789_v54 }
 0x637 PF: > { %p997_p10 = scmp.ne.s32.totalorder %s1745_s19, 1 }
 0x638   : > { %v798_v55 = vld [vmem:[#allocation3] sm:$0xff] (!%p997_p10)  ;;  %v799_v56 = vld [vmem:[#allocation3 + $0x8] sm:$0xff] (!%p997_p10)  ;;  %v1424_v57 = vmov (!%p997_p10), 0   ;;  %vm822_vm12 = vcmask (!%p997_p10), 261120  }
 0x639   : > { %797 = sbr.rel (%p997_p10) target bundleno = 1741 (0x6cd), region = 52  ;;  %1198 = vset.pattern.permute.xlu0 (!%p997_p10), %v1424_v57  ;;  %vm800_vm10 = vcmp.eq.f32.partialorder (!%p997_p10), %v798_v55, 0.0  ;;  %vm801_vm11 = vcmp.eq.f32.partialorder (!%p997_p10), %v799_v56, 0.0 }
 0x63a   : > { %v802_v58 = vsel (!%p997_p10), %vm800_vm10, 1.0, %v798_v55  ;;  %v803_v59 = vsel (!%p997_p10), %vm801_vm11, 1.0, %v799_v56 }
 0x63b   : > { %1199 = vrcp.f32 (!%p997_p10), %v802_v58 }
 0x63c   : > { %1201 = vrcp.f32 (!%p997_p10), %v803_v59  ;;  %v809_v1 = vld [vmem:[#allocation4 + $0x8] sm:$0xff] (!%p997_p10) }
 0x63d   : > { %v808_v62 = vld [vmem:[#allocation4] sm:$0xff] (!%p997_p10) }
 0x645   : > { %v1200_v60 = vpop.eup %1199 }
 0x646   : > { %812 = vperm.xlu0 %1198, %v1200_v60   ;;  %v1202_v61 = vpop.eup %1201 }
 0x64a   : > { %817 = vperm.xlu0 %1198, %v1202_v61  }
 0x6c5   : > { %v813_v63 = vpop.permute.xlu0 %812 }
 0x6c6   : > { %v820_v0 = vmul.f32 %v813_v63, %v808_v62 }
 0x6c8   : > { %823 = vst.msk [vmem:[%s1749_s23] sm:$0xff] %vm822_vm12, %v820_v0 }
 0x6c9   : > { %v818_v2 = vpop.permute.xlu0 %817 }
 0x6ca   : > { %v821_v3 = vmul.f32 %v818_v2, %v809_v1 }
 0x6cc   : > { %998 = vst.msk [vmem:[%s1749_s23 + $0x8] sm:$0xff] %vm822_vm12, %v821_v3 }
 0x6cd PF: > { %s834_s6 = sld [smem:[#allocation8]]  ;;  %s1955_s13 = sld [smem:[#allocation22_spill]] }
 0x6ce   : > { %s1956_s16 = sld [smem:[#allocation23_spill]]  ;;  %s1958_s12 = sld [smem:[#allocation27_spill]] }
 0x6cf   : > { %s844_s11 = sshll.u32 %s1749_s23, 4  ;;  %s1959_s21 = sld [smem:[#allocation29_spill]]  ;;  %s1823_s11 = int_to_ptr.vmem [resolvable:$true] %s844_s11 }
 0x6d0   : > { %s1832_s17 = scalar_lea.sflag [#allocation13], %s249_s20  ;;  %s1263_s25 = scalar_lea.vmem %s1823_s11, 256 }
 0x6d1   : > { %p1264_p4 = scmp.ne.s32.totalorder %s1823_s11, %s1263_s25  ;;  %s1425_s23 = smov [#allocation16]  }
 0x6d3   : > { %s1000_s28 = sshll.u32 %s1955_s13, 1 }
 0x6d4   : > { %s1001_s30 = sshll.u32 %s1956_s16, 2  ;;  %s839_s18 = sadd.s32 %s1000_s28, %s834_s6 }
 0x6d5   : > { %s841_s24 = sadd.s32 %s1001_s30, %s839_s18  ;;  %p1960_p9 = scmp.ne.s32.totalorder %s1958_s12, 0 }
 0x6d6   : > { %s1002_s19 = sshll.u32 %s841_s24, 7  ;;  %s1267_s6 = sshll.u32 %s1425_s23, 4  ;;  %s1268_s6 = int_to_ptr.vmem [resolvable:$false] %s1267_s6 }
 0x6d7   : > { %s1828_s0 = scalar_lea.hbm %s1959_s21, %s1002_s19  ;;  %p1265_p5 = pnand %p1264_p4, %p1960_p9 }
 0x6d8   : > { %s1269_s13 = scalar_lea.vmem %s1268_s6, 512  ;;  %p1270_p8 = scmp.lt.s32.totalorder %s1823_s11, %s1268_s6 }
 0x6d9   : > { %p1266_p3 = pneg %p1265_p5  ;;  %p1271_p0 = scmp.lt.s32.totalorder %s1269_s13, %s1263_s25 }
 0x6db   : > { %p1272_p2 = por %p1271_p0, %p1270_p8 }
 0x6dd   : > { %p1273_p1 = pnand %p1272_p2, %p1266_p3 }
 0x6df   : > { %1276 = shalt.err (!%p1273_p1)
}
 0x6e0   : > { %s1277_s20 = scalar_lea.hbm %s1828_s0, 256  ;;  %s1281_s28 = scalar_lea.hbm %s1959_s21, 1024 }
 0x6e1   : > { %p1278_p11 = scmp.ne.s32.totalorder %s1828_s0, %s1277_s20  ;;  %p1282_p6 = scmp.lt.u32.totalorder %s1828_s0, %s1959_s21 }
 0x6e2   : > { %p1283_p7 = scmp.lt.u32.totalorder %s1281_s28, %s1277_s20  ;;  %p1285_p4 = scmp.lt.u32.totalorder %s1277_s20, %s1828_s0 }
 0x6e3   : > { %p1279_p12 = pnand %p1278_p11, %p1960_p9 }
 0x6e4   : > { %p1284_p10 = por %p1283_p7, %p1282_p6 }
 0x6e5   : > { %p1280_p13 = pneg %p1279_p12 }
 0x6e6   : > { %p1286_p5 = por %p1285_p4, %p1284_p10 }
 0x6e8   : > { %p1287_p3 = pnand %p1286_p5, %p1280_p13 }
 0x6ea   : > { %1290 = shalt.err (!%p1287_p3)
}
 0x6eb   : > { %s1426_s24 = smov 128   ;;  %s1427_s19 = smov 8  }
 0x6ec   : > { %1041 = dma.vmem_to_hbm [thread:$0]  (%p1960_p9), %s1823_s11, 256, %s1828_s0, %s1832_s17, %s1426_s24, %s1426_s24, %s1427_s19  }
 0x6ed PF: > { %s1961_s22 = sld [smem:[#allocation20_spill]]  ;;  %s1962_s10 = sld [smem:[#allocation28_spill]] }
 0x6ee   : > { %p1055_p8 = scmp.ge.s32.totalorder %s1413_s9, 2 }
 0x6f3   : > { %s859_s25 = sand.u32 1, %s1961_s22   ;;  %p1963_p0 = scmp.ne.s32.totalorder %s1962_s10, 0 }
 0x6f4   : > { %s860_s23 = scalar_lea.sflag [#allocation13], %s859_s25 }
 0x6f5   : > { %p1051_p2 = pnand %p1055_p8, %p1963_p0 }
 0x6f7   : > { %1356 = dma.done.wait (!%p1051_p2), %s860_s23, 256  }
 0x6f8   : > { %1358 = vsyncadd (!%p1051_p2), %s860_s23, 4294967040  ;;  %s27_s9 = sadd.s32 1, %s1413_s9   ;;  %s1965_s24 = sld [smem:[#allocation21_spill]] }
 0x6f9   : > { %p1861_p1 = scmp.ge.s32.totalorder %s27_s9, 6   ;;  %s1966_s12 = sld [smem:[#allocation26_spill]] }
 0x6fa   : > { %s1967_s11 = sld [smem:[#allocation24_spill]]  ;;  %s1968_s17 = sld [smem:[#allocation25_spill]] }
 0x6fb   : > { %s1970_s25 = smov %s1369_s26  ;;  %s1971_s26 = smov %s1600_s14 }
 0x6fc   : > { %s1972_s0 = smov %s1377_s27  ;;  %s1973_s27 = smov %s1381_s1 }
 0x6fd   : > { %s1974_s1 = smov %s1674_s15  ;;  %s1975_s28 = smov %s1389_s2 }
 0x6fe   : > { %s1976_s2 = smov %s1393_s29  ;;  %s1978_s30 = smov %s1405_s7 }
 0x6ff   : > { %s1977_s29 = smov %s1966_s12  ;;  %s1979_s6 = smov %s1409_s8 }
 0x700   : > { %s1980_s7 = smov %s1967_s11  ;;  %s1981_s8 = smov %s1968_s17 }
 0x701   :  { %26 = sbr.rel (!%p1861_p1) target bundleno = 17 (0x11), region = 106 }
 0x708   :  { %865 = vsyncpa [#allocation12], 1 }
 0x709   :  { %867 = vsyncpa [#allocation12 + $0x1], 1 }
 0x70a   :  { %868 = vsyncpa [#allocation15], 1 }
 0x70b   :  { %870 = vsyncpa [#allocation15 + $0x1], 1 }
 0x70c   :  { %871 = vsyncpa [#allocation13], 1 }
 0x70d   :  { %873 = vsyncpa [#allocation13 + $0x1], 1 }

</bundles_post_ra>
